<compile_context>
chip_gen: v6e
topology: v6e:2x2x1
jax: 0.10.0
libtpu: 0.0.40
codegen_flags: <defaults>
</compile_context>

<pallas_src>
import math

import jax
import jax.numpy as jnp
import numpy as np
from jax.experimental import pallas as pl
from jax.experimental.pallas import tpu as pltpu


def _round_up(v: int, m: int) -> int:
    return (v + m - 1) // m * m


def _pick_tile(n: int, tn: int) -> int:
    """Lane tile: multiple of 128, <= tn, and >=2 grid steps when possible
    (a 1-step grid would idle one of the two v7x TensorCores)."""
    tn = max(128, _round_up(int(tn), 128))
    n_aligned = _round_up(max(int(n), 1), 128)
    half = _round_up((n_aligned + 1) // 2, 128)
    return max(128, min(tn, n_aligned, half))


def _emit_rows(x, in_dims: int, freqs: int, add_position: bool, out_ref):
    """Compute all output feature rows for a lane-dense (in_dims, TN) block `x`
    and store each row at its final static sublane offset in `out_ref`.

    Row ordering matches the PyTorch module: [x (if add_position)] ++
    sin rows (dim-major, freq-minor) ++ "sin(.+pi/2)" rows == cos rows.
    Frequencies come from the angle-doubling recurrence
        s_{f+1} = 2 s_f c_f ,  c_{f+1} = 1 - 2 s_f^2
    (2 transcendentals per (point, dim) instead of 2*freqs; error grows ~2-4x
    per doubling -- fine at freqs=4; switch to exact sin/cos for very large freqs).
    """
    base = in_dims if add_position else 0
    if add_position:
        out_ref[pl.ds(0, in_dims), :] = x                    # own small store
    s = jnp.sin(math.pi * x)                                  # (in_dims, TN)
    c = jnp.cos(math.pi * x)                                  # (in_dims, TN)
    for f in range(freqs):
        for d in range(in_dims):
            out_ref[pl.ds(base + d * freqs + f, 1), :] = s[d:d + 1, :]
            out_ref[pl.ds(base + in_dims * freqs + d * freqs + f, 1), :] = c[d:d + 1, :]
        if f + 1 < freqs:
            s, c = 2.0 * s * c, 1.0 - 2.0 * s * s


def _make_natural_kernel(in_dims, freqs, add_position, out_dims, tn, chunk=512):
    chunk = min(chunk, tn)

    def kernel(x_ref, o_ref, slab_ref):
        # x_ref: (in_dims, TN)   o_ref: (TN, out_dims)   slab_ref: (r8, TN)
        _emit_rows(x_ref[...], in_dims, freqs, add_position, slab_ref)
        # Feature-major slab -> natural-layout output, transposed in lane
        # chunks so live values stay well inside the 64-vreg file.
        for off in range(0, tn, chunk):
            csz = min(chunk, tn - off)
            blk = slab_ref[:, pl.ds(off, csz)]                # (r8, csz)
            o_ref[pl.ds(off, csz), :] = jnp.swapaxes(blk, 0, 1)[:, :out_dims]

    return kernel


def _make_feature_major_kernel(in_dims, freqs, add_position):
    def kernel(x_ref, o_ref):
        # x_ref: (in_dims, TN)   o_ref: (out_dims, TN)
        _emit_rows(x_ref[...], in_dims, freqs, add_position, o_ref)

    return kernel


def _call_natural(xt, n, in_dims, out_dims, freqs, add_position, tn_eff):
    grid = (pl.cdiv(n, tn_eff),)
    r8 = _round_up(out_dims, 8)
    kernel = _make_natural_kernel(in_dims, freqs, add_position, out_dims, tn_eff)
    return pl.pallas_call(
        kernel,
        out_shape=jax.ShapeDtypeStruct((n, out_dims), jnp.float32),
        grid_spec=pltpu.PrefetchScalarGridSpec(
            num_scalar_prefetch=0,
            grid=grid,
            in_specs=[pl.BlockSpec((in_dims, tn_eff), lambda i: (0, i))],
            out_specs=pl.BlockSpec((tn_eff, out_dims), lambda i: (i, 0)),
            scratch_shapes=[pltpu.VMEM((r8, tn_eff), jnp.float32)],
        ),
        compiler_params=pltpu.CompilerParams(dimension_semantics=("parallel",)),
    )(xt)


def _call_feature_major(xt, n, in_dims, out_dims, freqs, add_position, tn_eff):
    grid = (pl.cdiv(n, tn_eff),)
    kernel = _make_feature_major_kernel(in_dims, freqs, add_position)
    return pl.pallas_call(
        kernel,
        out_shape=jax.ShapeDtypeStruct((out_dims, n), jnp.float32),
        grid_spec=pltpu.PrefetchScalarGridSpec(
            num_scalar_prefetch=0,
            grid=grid,
            in_specs=[pl.BlockSpec((in_dims, tn_eff), lambda i: (0, i))],
            out_specs=pl.BlockSpec((out_dims, tn_eff), lambda i: (0, i)),
        ),
        compiler_params=pltpu.CompilerParams(dimension_semantics=("parallel",)),
    )(xt)


_FUSED_TRANSPOSE_OK = None  # None = untested, True/False after first attempt


def frequency_embedding(x, freqs: int, add_position: bool, tn: int = 16384):
    """Pallas TPU implementation of FrequencyEmbedding.forward."""
    global _FUSED_TRANSPOSE_OK
    x = jnp.asarray(x, jnp.float32)
    *lead, in_dims = x.shape
    out_dims = in_dims * (2 * freqs + 1) if add_position else in_dims * 2 * freqs

    n = int(np.prod(lead)) if lead else 1
    xt = x.reshape(n, in_dims).T          # feature-major (in_dims, N); cheap vs output
    tn_eff = _pick_tile(n, tn)

    if _FUSED_TRANSPOSE_OK is not False:
        try:
            out = _call_natural(xt, n, in_dims, out_dims, freqs, add_position, tn_eff)
            if _FUSED_TRANSPOSE_OK is None:
                jax.block_until_ready(out)   # force compile+run once for the probe
                _FUSED_TRANSPOSE_OK = True
            return out.reshape(*lead, out_dims)
        except Exception:
            # TODO(synk): in-kernel (r8, TN)->(TN, r8) transpose did not lower on
            # this jax/libtpu version; fall back to feature-major kernel +
            # wrapper transpose (correct, ~2x more HBM traffic).
            _FUSED_TRANSPOSE_OK = False

    out_t = _call_feature_major(xt, n, in_dims, out_dims, freqs, add_position, tn_eff)
    return out_t.T.reshape(*lead, out_dims)


def _reference(x, freqs: int, add_position: bool):
    """Pure-jnp reference mirroring the PyTorch code."""
    x = jnp.asarray(x, jnp.float32)
    k = jnp.arange(freqs, dtype=jnp.float32)
    bands = (2.0 ** k) * jnp.float32(math.pi)
    spectrum = x[..., None] * bands                            # (..., D, F)
    spectrum = spectrum.reshape(*x.shape[:-1], -1)             # (..., D*F)
    spectrum = jnp.concatenate(
        [spectrum, spectrum + jnp.float32(0.5 * math.pi)], axis=-1)
    if add_position:
        return jnp.concatenate([x, jnp.sin(spectrum)], axis=-1)
    return jnp.sin(spectrum)


if __name__ == "__main__":
    in_dims = 3
    freqs = 4

    key = jax.random.PRNGKey(0)
    k1, k2 = jax.random.split(key)
    tests = [
        jax.random.normal(k1, (2, 16, in_dims), dtype=jnp.float32),
        # multi-block grid + ragged last tile
        jax.random.normal(k2, (5, 300, in_dims), dtype=jnp.float32),
    ]

    for x in tests:
        for add_position in (True, False):
            out = jax.block_until_ready(
                frequency_embedding(x, freqs=freqs, add_position=add_position))
            ref = _reference(x, freqs, add_position)
            expected_dims = (in_dims * (2 * freqs + 1) if add_position
                             else in_dims * 2 * freqs)
            assert out.shape == (*x.shape[:-1], expected_dims), out.shape
            # cos(theta) vs the reference's sin(theta + fl(pi/2)) and the
            # angle-doubling recurrence differ by a few 1e-6 at freqs=4.
            np.testing.assert_allclose(np.asarray(out), np.asarray(ref),
                                       rtol=1e-5, atol=2e-5)

    print("KERNEL_OK")
</pallas_src>

<mosaic_0001>
module attributes {stable_mosaic.version = 11 : i64} {
  func.func @kernel(%arg0: i32, %arg1: memref<3x128xf32, #tpu.memory_space<vmem>>, %arg2: memref<128x27xf32, #tpu.memory_space<vmem>>, %arg3: memref<32x128xf32, #tpu.memory_space<vmem>>) attributes {dimension_semantics = [#tpu.dimension_semantics<parallel>], iteration_bounds = array<i64: 1>, scalar_prefetch = 0 : i64, scratch_operands = 1 : i64, tpu.core_type = #tpu.core_type<tc>, window_params = [{transform_indices = @transform_0, window_bounds = array<i64: 3, 128>}, {transform_indices = @transform_1, window_bounds = array<i64: 128, 27>}]} {
    %c0 = arith.constant 0 : index
    %c0_0 = arith.constant 0 : index
    %0 = vector.load %arg1[%c0, %c0_0] : memref<3x128xf32, #tpu.memory_space<vmem>>, vector<3x128xf32>
    %c0_1 = arith.constant 0 : index
    %c0_2 = arith.constant 0 : index
    %1 = vector.load %arg3[%c0_1, %c0_2] : memref<32x128xf32, #tpu.memory_space<vmem>>, vector<3x128xf32>
    tpu.vector_store %arg3[%c0_1, %c0_2], %0 {strides = array<i32>} : memref<32x128xf32, #tpu.memory_space<vmem>>, vector<3x128xf32>,
    %cst = arith.constant 3.14159274 : f32
    %2 = vector.broadcast %cst : f32 to vector<3x128xf32>
    %3 = arith.mulf %2, %0 : vector<3x128xf32>
    %4 = math.sin %3 : vector<3x128xf32>
    %cst_3 = arith.constant 3.14159274 : f32
    %5 = vector.broadcast %cst_3 : f32 to vector<3x128xf32>
    %6 = arith.mulf %5, %0 : vector<3x128xf32>
    %7 = math.cos %6 : vector<3x128xf32>
    %8 = vector.extract_strided_slice %4 {offsets = [0, 0], sizes = [1, 128], strides = [1, 1]} : vector<3x128xf32> to vector<1x128xf32>
    %c3 = arith.constant 3 : index
    %c0_4 = arith.constant 0 : index
    %9 = vector.load %arg3[%c3, %c0_4] : memref<32x128xf32, #tpu.memory_space<vmem>>, vector<1x128xf32>
    tpu.vector_store %arg3[%c3, %c0_4], %8 {strides = array<i32>} : memref<32x128xf32, #tpu.memory_space<vmem>>, vector<1x128xf32>,
    %10 = vector.extract_strided_slice %7 {offsets = [0, 0], sizes = [1, 128], strides = [1, 1]} : vector<3x128xf32> to vector<1x128xf32>
    %c15 = arith.constant 15 : index
    %c0_5 = arith.constant 0 : index
    %11 = vector.load %arg3[%c15, %c0_5] : memref<32x128xf32, #tpu.memory_space<vmem>>, vector<1x128xf32>
    tpu.vector_store %arg3[%c15, %c0_5], %10 {strides = array<i32>} : memref<32x128xf32, #tpu.memory_space<vmem>>, vector<1x128xf32>,
    %12 = vector.extract_strided_slice %4 {offsets = [1, 0], sizes = [1, 128], strides = [1, 1]} : vector<3x128xf32> to vector<1x128xf32>
    %c7 = arith.constant 7 : index
    %c0_6 = arith.constant 0 : index
    %13 = vector.load %arg3[%c7, %c0_6] : memref<32x128xf32, #tpu.memory_space<vmem>>, vector<1x128xf32>
    tpu.vector_store %arg3[%c7, %c0_6], %12 {strides = array<i32>} : memref<32x128xf32, #tpu.memory_space<vmem>>, vector<1x128xf32>,
    %14 = vector.extract_strided_slice %7 {offsets = [1, 0], sizes = [1, 128], strides = [1, 1]} : vector<3x128xf32> to vector<1x128xf32>
    %c19 = arith.constant 19 : index
    %c0_7 = arith.constant 0 : index
    %15 = vector.load %arg3[%c19, %c0_7] : memref<32x128xf32, #tpu.memory_space<vmem>>, vector<1x128xf32>
    tpu.vector_store %arg3[%c19, %c0_7], %14 {strides = array<i32>} : memref<32x128xf32, #tpu.memory_space<vmem>>, vector<1x128xf32>,
    %16 = vector.extract_strided_slice %4 {offsets = [2, 0], sizes = [1, 128], strides = [1, 1]} : vector<3x128xf32> to vector<1x128xf32>
    %c11 = arith.constant 11 : index
    %c0_8 = arith.constant 0 : index
    %17 = vector.load %arg3[%c11, %c0_8] : memref<32x128xf32, #tpu.memory_space<vmem>>, vector<1x128xf32>
    tpu.vector_store %arg3[%c11, %c0_8], %16 {strides = array<i32>} : memref<32x128xf32, #tpu.memory_space<vmem>>, vector<1x128xf32>,
    %18 = vector.extract_strided_slice %7 {offsets = [2, 0], sizes = [1, 128], strides = [1, 1]} : vector<3x128xf32> to vector<1x128xf32>
    %c23 = arith.constant 23 : index
    %c0_9 = arith.constant 0 : index
    %19 = vector.load %arg3[%c23, %c0_9] : memref<32x128xf32, #tpu.memory_space<vmem>>, vector<1x128xf32>
    tpu.vector_store %arg3[%c23, %c0_9], %18 {strides = array<i32>} : memref<32x128xf32, #tpu.memory_space<vmem>>, vector<1x128xf32>,
    %cst_10 = arith.constant 2.000000e+00 : f32
    %20 = vector.broadcast %cst_10 : f32 to vector<3x128xf32>
    %21 = arith.mulf %20, %4 : vector<3x128xf32>
    %22 = arith.mulf %21, %7 : vector<3x128xf32>
    %cst_11 = arith.constant 2.000000e+00 : f32
    %23 = vector.broadcast %cst_11 : f32 to vector<3x128xf32>
    %24 = arith.mulf %23, %4 : vector<3x128xf32>
    %25 = arith.mulf %24, %4 : vector<3x128xf32>
    %cst_12 = arith.constant 1.000000e+00 : f32
    %26 = vector.broadcast %cst_12 : f32 to vector<3x128xf32>
    %27 = arith.subf %26, %25 : vector<3x128xf32>
    %28 = vector.extract_strided_slice %22 {offsets = [0, 0], sizes = [1, 128], strides = [1, 1]} : vector<3x128xf32> to vector<1x128xf32>
    %c4 = arith.constant 4 : index
    %c0_13 = arith.constant 0 : index
    %29 = vector.load %arg3[%c4, %c0_13] : memref<32x128xf32, #tpu.memory_space<vmem>>, vector<1x128xf32>
    tpu.vector_store %arg3[%c4, %c0_13], %28 {strides = array<i32>} : memref<32x128xf32, #tpu.memory_space<vmem>>, vector<1x128xf32>,
    %30 = vector.extract_strided_slice %27 {offsets = [0, 0], sizes = [1, 128], strides = [1, 1]} : vector<3x128xf32> to vector<1x128xf32>
    %c16 = arith.constant 16 : index
    %c0_14 = arith.constant 0 : index
    %31 = vector.load %arg3[%c16, %c0_14] : memref<32x128xf32, #tpu.memory_space<vmem>>, vector<1x128xf32>
    tpu.vector_store %arg3[%c16, %c0_14], %30 {strides = array<i32>} : memref<32x128xf32, #tpu.memory_space<vmem>>, vector<1x128xf32>,
    %32 = vector.extract_strided_slice %22 {offsets = [1, 0], sizes = [1, 128], strides = [1, 1]} : vector<3x128xf32> to vector<1x128xf32>
    %c8 = arith.constant 8 : index
    %c0_15 = arith.constant 0 : index
    %33 = vector.load %arg3[%c8, %c0_15] : memref<32x128xf32, #tpu.memory_space<vmem>>, vector<1x128xf32>
    tpu.vector_store %arg3[%c8, %c0_15], %32 {strides = array<i32>} : memref<32x128xf32, #tpu.memory_space<vmem>>, vector<1x128xf32>,
    %34 = vector.extract_strided_slice %27 {offsets = [1, 0], sizes = [1, 128], strides = [1, 1]} : vector<3x128xf32> to vector<1x128xf32>
    %c20 = arith.constant 20 : index
    %c0_16 = arith.constant 0 : index
    %35 = vector.load %arg3[%c20, %c0_16] : memref<32x128xf32, #tpu.memory_space<vmem>>, vector<1x128xf32>
    tpu.vector_store %arg3[%c20, %c0_16], %34 {strides = array<i32>} : memref<32x128xf32, #tpu.memory_space<vmem>>, vector<1x128xf32>,
    %36 = vector.extract_strided_slice %22 {offsets = [2, 0], sizes = [1, 128], strides = [1, 1]} : vector<3x128xf32> to vector<1x128xf32>
    %c12 = arith.constant 12 : index
    %c0_17 = arith.constant 0 : index
    %37 = vector.load %arg3[%c12, %c0_17] : memref<32x128xf32, #tpu.memory_space<vmem>>, vector<1x128xf32>
    tpu.vector_store %arg3[%c12, %c0_17], %36 {strides = array<i32>} : memref<32x128xf32, #tpu.memory_space<vmem>>, vector<1x128xf32>,
    %38 = vector.extract_strided_slice %27 {offsets = [2, 0], sizes = [1, 128], strides = [1, 1]} : vector<3x128xf32> to vector<1x128xf32>
    %c24 = arith.constant 24 : index
    %c0_18 = arith.constant 0 : index
    %39 = vector.load %arg3[%c24, %c0_18] : memref<32x128xf32, #tpu.memory_space<vmem>>, vector<1x128xf32>
    tpu.vector_store %arg3[%c24, %c0_18], %38 {strides = array<i32>} : memref<32x128xf32, #tpu.memory_space<vmem>>, vector<1x128xf32>,
    %cst_19 = arith.constant 2.000000e+00 : f32
    %40 = vector.broadcast %cst_19 : f32 to vector<3x128xf32>
    %41 = arith.mulf %40, %22 : vector<3x128xf32>
    %42 = arith.mulf %41, %27 : vector<3x128xf32>
    %cst_20 = arith.constant 2.000000e+00 : f32
    %43 = vector.broadcast %cst_20 : f32 to vector<3x128xf32>
    %44 = arith.mulf %43, %22 : vector<3x128xf32>
    %45 = arith.mulf %44, %22 : vector<3x128xf32>
    %cst_21 = arith.constant 1.000000e+00 : f32
    %46 = vector.broadcast %cst_21 : f32 to vector<3x128xf32>
    %47 = arith.subf %46, %45 : vector<3x128xf32>
    %48 = vector.extract_strided_slice %42 {offsets = [0, 0], sizes = [1, 128], strides = [1, 1]} : vector<3x128xf32> to vector<1x128xf32>
    %c5 = arith.constant 5 : index
    %c0_22 = arith.constant 0 : index
    %49 = vector.load %arg3[%c5, %c0_22] : memref<32x128xf32, #tpu.memory_space<vmem>>, vector<1x128xf32>
    tpu.vector_store %arg3[%c5, %c0_22], %48 {strides = array<i32>} : memref<32x128xf32, #tpu.memory_space<vmem>>, vector<1x128xf32>,
    %50 = vector.extract_strided_slice %47 {offsets = [0, 0], sizes = [1, 128], strides = [1, 1]} : vector<3x128xf32> to vector<1x128xf32>
    %c17 = arith.constant 17 : index
    %c0_23 = arith.constant 0 : index
    %51 = vector.load %arg3[%c17, %c0_23] : memref<32x128xf32, #tpu.memory_space<vmem>>, vector<1x128xf32>
    tpu.vector_store %arg3[%c17, %c0_23], %50 {strides = array<i32>} : memref<32x128xf32, #tpu.memory_space<vmem>>, vector<1x128xf32>,
    %52 = vector.extract_strided_slice %42 {offsets = [1, 0], sizes = [1, 128], strides = [1, 1]} : vector<3x128xf32> to vector<1x128xf32>
    %c9 = arith.constant 9 : index
    %c0_24 = arith.constant 0 : index
    %53 = vector.load %arg3[%c9, %c0_24] : memref<32x128xf32, #tpu.memory_space<vmem>>, vector<1x128xf32>
    tpu.vector_store %arg3[%c9, %c0_24], %52 {strides = array<i32>} : memref<32x128xf32, #tpu.memory_space<vmem>>, vector<1x128xf32>,
    %54 = vector.extract_strided_slice %47 {offsets = [1, 0], sizes = [1, 128], strides = [1, 1]} : vector<3x128xf32> to vector<1x128xf32>
    %c21 = arith.constant 21 : index
    %c0_25 = arith.constant 0 : index
    %55 = vector.load %arg3[%c21, %c0_25] : memref<32x128xf32, #tpu.memory_space<vmem>>, vector<1x128xf32>
    tpu.vector_store %arg3[%c21, %c0_25], %54 {strides = array<i32>} : memref<32x128xf32, #tpu.memory_space<vmem>>, vector<1x128xf32>,
    %56 = vector.extract_strided_slice %42 {offsets = [2, 0], sizes = [1, 128], strides = [1, 1]} : vector<3x128xf32> to vector<1x128xf32>
    %c13 = arith.constant 13 : index
    %c0_26 = arith.constant 0 : index
    %57 = vector.load %arg3[%c13, %c0_26] : memref<32x128xf32, #tpu.memory_space<vmem>>, vector<1x128xf32>
    tpu.vector_store %arg3[%c13, %c0_26], %56 {strides = array<i32>} : memref<32x128xf32, #tpu.memory_space<vmem>>, vector<1x128xf32>,
    %58 = vector.extract_strided_slice %47 {offsets = [2, 0], sizes = [1, 128], strides = [1, 1]} : vector<3x128xf32> to vector<1x128xf32>
    %c25 = arith.constant 25 : index
    %c0_27 = arith.constant 0 : index
    %59 = vector.load %arg3[%c25, %c0_27] : memref<32x128xf32, #tpu.memory_space<vmem>>, vector<1x128xf32>
    tpu.vector_store %arg3[%c25, %c0_27], %58 {strides = array<i32>} : memref<32x128xf32, #tpu.memory_space<vmem>>, vector<1x128xf32>,
    %cst_28 = arith.constant 2.000000e+00 : f32
    %60 = vector.broadcast %cst_28 : f32 to vector<3x128xf32>
    %61 = arith.mulf %60, %42 : vector<3x128xf32>
    %62 = arith.mulf %61, %47 : vector<3x128xf32>
    %cst_29 = arith.constant 2.000000e+00 : f32
    %63 = vector.broadcast %cst_29 : f32 to vector<3x128xf32>
    %64 = arith.mulf %63, %42 : vector<3x128xf32>
    %65 = arith.mulf %64, %42 : vector<3x128xf32>
    %cst_30 = arith.constant 1.000000e+00 : f32
    %66 = vector.broadcast %cst_30 : f32 to vector<3x128xf32>
    %67 = arith.subf %66, %65 : vector<3x128xf32>
    %68 = vector.extract_strided_slice %62 {offsets = [0, 0], sizes = [1, 128], strides = [1, 1]} : vector<3x128xf32> to vector<1x128xf32>
    %c6 = arith.constant 6 : index
    %c0_31 = arith.constant 0 : index
    %69 = vector.load %arg3[%c6, %c0_31] : memref<32x128xf32, #tpu.memory_space<vmem>>, vector<1x128xf32>
    tpu.vector_store %arg3[%c6, %c0_31], %68 {strides = array<i32>} : memref<32x128xf32, #tpu.memory_space<vmem>>, vector<1x128xf32>,
    %70 = vector.extract_strided_slice %67 {offsets = [0, 0], sizes = [1, 128], strides = [1, 1]} : vector<3x128xf32> to vector<1x128xf32>
    %c18 = arith.constant 18 : index
    %c0_32 = arith.constant 0 : index
    %71 = vector.load %arg3[%c18, %c0_32] : memref<32x128xf32, #tpu.memory_space<vmem>>, vector<1x128xf32>
    tpu.vector_store %arg3[%c18, %c0_32], %70 {strides = array<i32>} : memref<32x128xf32, #tpu.memory_space<vmem>>, vector<1x128xf32>,
    %72 = vector.extract_strided_slice %62 {offsets = [1, 0], sizes = [1, 128], strides = [1, 1]} : vector<3x128xf32> to vector<1x128xf32>
    %c10 = arith.constant 10 : index
    %c0_33 = arith.constant 0 : index
    %73 = vector.load %arg3[%c10, %c0_33] : memref<32x128xf32, #tpu.memory_space<vmem>>, vector<1x128xf32>
    tpu.vector_store %arg3[%c10, %c0_33], %72 {strides = array<i32>} : memref<32x128xf32, #tpu.memory_space<vmem>>, vector<1x128xf32>,
    %74 = vector.extract_strided_slice %67 {offsets = [1, 0], sizes = [1, 128], strides = [1, 1]} : vector<3x128xf32> to vector<1x128xf32>
    %c22 = arith.constant 22 : index
    %c0_34 = arith.constant 0 : index
    %75 = vector.load %arg3[%c22, %c0_34] : memref<32x128xf32, #tpu.memory_space<vmem>>, vector<1x128xf32>
    tpu.vector_store %arg3[%c22, %c0_34], %74 {strides = array<i32>} : memref<32x128xf32, #tpu.memory_space<vmem>>, vector<1x128xf32>,
    %76 = vector.extract_strided_slice %62 {offsets = [2, 0], sizes = [1, 128], strides = [1, 1]} : vector<3x128xf32> to vector<1x128xf32>
    %c14 = arith.constant 14 : index
    %c0_35 = arith.constant 0 : index
    %77 = vector.load %arg3[%c14, %c0_35] : memref<32x128xf32, #tpu.memory_space<vmem>>, vector<1x128xf32>
    tpu.vector_store %arg3[%c14, %c0_35], %76 {strides = array<i32>} : memref<32x128xf32, #tpu.memory_space<vmem>>, vector<1x128xf32>,
    %78 = vector.extract_strided_slice %67 {offsets = [2, 0], sizes = [1, 128], strides = [1, 1]} : vector<3x128xf32> to vector<1x128xf32>
    %c26 = arith.constant 26 : index
    %c0_36 = arith.constant 0 : index
    %79 = vector.load %arg3[%c26, %c0_36] : memref<32x128xf32, #tpu.memory_space<vmem>>, vector<1x128xf32>
    tpu.vector_store %arg3[%c26, %c0_36], %78 {strides = array<i32>} : memref<32x128xf32, #tpu.memory_space<vmem>>, vector<1x128xf32>,
    %c0_37 = arith.constant 0 : index
    %c0_38 = arith.constant 0 : index
    %80 = vector.load %arg3[%c0_37, %c0_38] : memref<32x128xf32, #tpu.memory_space<vmem>>, vector<32x128xf32>
    %81 = tpu.transpose %80, [1, 0] : vector<32x128xf32> -> vector<128x32xf32>
    %82 = vector.extract_strided_slice %81 {offsets = [0, 0], sizes = [128, 27], strides = [1, 1]} : vector<128x32xf32> to vector<128x27xf32>
    %c0_39 = arith.constant 0 : index
    %c0_40 = arith.constant 0 : index
    %83 = vector.load %arg2[%c0_39, %c0_40] : memref<128x27xf32, #tpu.memory_space<vmem>>, vector<128x27xf32>
    tpu.vector_store %arg2[%c0_39, %c0_40], %82 {strides = array<i32>} : memref<128x27xf32, #tpu.memory_space<vmem>>, vector<128x27xf32>,
    return
  }
  func.func @transform_0(%arg0: i32) -> (i32, i32) {
    %c0_i32 = arith.constant 0 : i32
    %c0_i32_0 = arith.constant 0 : i32
    return %c0_i32, %arg0 : i32, i32
  }
  func.func @transform_1(%arg0: i32) -> (i32, i32) {
    %c0_i32 = arith.constant 0 : i32
    %c0_i32_0 = arith.constant 0 : i32
    return %arg0, %c0_i32 : i32, i32
  }
}

module attributes {stable_mosaic.version = 11 : i64} {
  func.func @kernel(%arg0: i32, %arg1: memref<3x128xf32, #tpu.memory_space<vmem>>, %arg2: memref<27x128xf32, #tpu.memory_space<vmem>>) attributes {dimension_semantics = [#tpu.dimension_semantics<parallel>], iteration_bounds = array<i64: 1>, scalar_prefetch = 0 : i64, scratch_operands = 0 : i64, tpu.core_type = #tpu.core_type<tc>, window_params = [{transform_indices = @transform_0, window_bounds = array<i64: 3, 128>}, {transform_indices = @transform_1, window_bounds = array<i64: 27, 128>}]} {
    %c0 = arith.constant 0 : index
    %c0_0 = arith.constant 0 : index
    %0 = vector.load %arg1[%c0, %c0_0] : memref<3x128xf32, #tpu.memory_space<vmem>>, vector<3x128xf32>
    %c0_1 = arith.constant 0 : index
    %c0_2 = arith.constant 0 : index
    %1 = vector.load %arg2[%c0_1, %c0_2] : memref<27x128xf32, #tpu.memory_space<vmem>>, vector<3x128xf32>
    tpu.vector_store %arg2[%c0_1, %c0_2], %0 {strides = array<i32>} : memref<27x128xf32, #tpu.memory_space<vmem>>, vector<3x128xf32>,
    %cst = arith.constant 3.14159274 : f32
    %2 = vector.broadcast %cst : f32 to vector<3x128xf32>
    %3 = arith.mulf %2, %0 : vector<3x128xf32>
    %4 = math.sin %3 : vector<3x128xf32>
    %cst_3 = arith.constant 3.14159274 : f32
    %5 = vector.broadcast %cst_3 : f32 to vector<3x128xf32>
    %6 = arith.mulf %5, %0 : vector<3x128xf32>
    %7 = math.cos %6 : vector<3x128xf32>
    %8 = vector.extract_strided_slice %4 {offsets = [0, 0], sizes = [1, 128], strides = [1, 1]} : vector<3x128xf32> to vector<1x128xf32>
    %c3 = arith.constant 3 : index
    %c0_4 = arith.constant 0 : index
    %9 = vector.load %arg2[%c3, %c0_4] : memref<27x128xf32, #tpu.memory_space<vmem>>, vector<1x128xf32>
    tpu.vector_store %arg2[%c3, %c0_4], %8 {strides = array<i32>} : memref<27x128xf32, #tpu.memory_space<vmem>>, vector<1x128xf32>,
    %10 = vector.extract_strided_slice %7 {offsets = [0, 0], sizes = [1, 128], strides = [1, 1]} : vector<3x128xf32> to vector<1x128xf32>
    %c15 = arith.constant 15 : index
    %c0_5 = arith.constant 0 : index
    %11 = vector.load %arg2[%c15, %c0_5] : memref<27x128xf32, #tpu.memory_space<vmem>>, vector<1x128xf32>
    tpu.vector_store %arg2[%c15, %c0_5], %10 {strides = array<i32>} : memref<27x128xf32, #tpu.memory_space<vmem>>, vector<1x128xf32>,
    %12 = vector.extract_strided_slice %4 {offsets = [1, 0], sizes = [1, 128], strides = [1, 1]} : vector<3x128xf32> to vector<1x128xf32>
    %c7 = arith.constant 7 : index
    %c0_6 = arith.constant 0 : index
    %13 = vector.load %arg2[%c7, %c0_6] : memref<27x128xf32, #tpu.memory_space<vmem>>, vector<1x128xf32>
    tpu.vector_store %arg2[%c7, %c0_6], %12 {strides = array<i32>} : memref<27x128xf32, #tpu.memory_space<vmem>>, vector<1x128xf32>,
    %14 = vector.extract_strided_slice %7 {offsets = [1, 0], sizes = [1, 128], strides = [1, 1]} : vector<3x128xf32> to vector<1x128xf32>
    %c19 = arith.constant 19 : index
    %c0_7 = arith.constant 0 : index
    %15 = vector.load %arg2[%c19, %c0_7] : memref<27x128xf32, #tpu.memory_space<vmem>>, vector<1x128xf32>
    tpu.vector_store %arg2[%c19, %c0_7], %14 {strides = array<i32>} : memref<27x128xf32, #tpu.memory_space<vmem>>, vector<1x128xf32>,
    %16 = vector.extract_strided_slice %4 {offsets = [2, 0], sizes = [1, 128], strides = [1, 1]} : vector<3x128xf32> to vector<1x128xf32>
    %c11 = arith.constant 11 : index
    %c0_8 = arith.constant 0 : index
    %17 = vector.load %arg2[%c11, %c0_8] : memref<27x128xf32, #tpu.memory_space<vmem>>, vector<1x128xf32>
    tpu.vector_store %arg2[%c11, %c0_8], %16 {strides = array<i32>} : memref<27x128xf32, #tpu.memory_space<vmem>>, vector<1x128xf32>,
    %18 = vector.extract_strided_slice %7 {offsets = [2, 0], sizes = [1, 128], strides = [1, 1]} : vector<3x128xf32> to vector<1x128xf32>
    %c23 = arith.constant 23 : index
    %c0_9 = arith.constant 0 : index
    %19 = vector.load %arg2[%c23, %c0_9] : memref<27x128xf32, #tpu.memory_space<vmem>>, vector<1x128xf32>
    tpu.vector_store %arg2[%c23, %c0_9], %18 {strides = array<i32>} : memref<27x128xf32, #tpu.memory_space<vmem>>, vector<1x128xf32>,
    %cst_10 = arith.constant 2.000000e+00 : f32
    %20 = vector.broadcast %cst_10 : f32 to vector<3x128xf32>
    %21 = arith.mulf %20, %4 : vector<3x128xf32>
    %22 = arith.mulf %21, %7 : vector<3x128xf32>
    %cst_11 = arith.constant 2.000000e+00 : f32
    %23 = vector.broadcast %cst_11 : f32 to vector<3x128xf32>
    %24 = arith.mulf %23, %4 : vector<3x128xf32>
    %25 = arith.mulf %24, %4 : vector<3x128xf32>
    %cst_12 = arith.constant 1.000000e+00 : f32
    %26 = vector.broadcast %cst_12 : f32 to vector<3x128xf32>
    %27 = arith.subf %26, %25 : vector<3x128xf32>
    %28 = vector.extract_strided_slice %22 {offsets = [0, 0], sizes = [1, 128], strides = [1, 1]} : vector<3x128xf32> to vector<1x128xf32>
    %c4 = arith.constant 4 : index
    %c0_13 = arith.constant 0 : index
    %29 = vector.load %arg2[%c4, %c0_13] : memref<27x128xf32, #tpu.memory_space<vmem>>, vector<1x128xf32>
    tpu.vector_store %arg2[%c4, %c0_13], %28 {strides = array<i32>} : memref<27x128xf32, #tpu.memory_space<vmem>>, vector<1x128xf32>,
    %30 = vector.extract_strided_slice %27 {offsets = [0, 0], sizes = [1, 128], strides = [1, 1]} : vector<3x128xf32> to vector<1x128xf32>
    %c16 = arith.constant 16 : index
    %c0_14 = arith.constant 0 : index
    %31 = vector.load %arg2[%c16, %c0_14] : memref<27x128xf32, #tpu.memory_space<vmem>>, vector<1x128xf32>
    tpu.vector_store %arg2[%c16, %c0_14], %30 {strides = array<i32>} : memref<27x128xf32, #tpu.memory_space<vmem>>, vector<1x128xf32>,
    %32 = vector.extract_strided_slice %22 {offsets = [1, 0], sizes = [1, 128], strides = [1, 1]} : vector<3x128xf32> to vector<1x128xf32>
    %c8 = arith.constant 8 : index
    %c0_15 = arith.constant 0 : index
    %33 = vector.load %arg2[%c8, %c0_15] : memref<27x128xf32, #tpu.memory_space<vmem>>, vector<1x128xf32>
    tpu.vector_store %arg2[%c8, %c0_15], %32 {strides = array<i32>} : memref<27x128xf32, #tpu.memory_space<vmem>>, vector<1x128xf32>,
    %34 = vector.extract_strided_slice %27 {offsets = [1, 0], sizes = [1, 128], strides = [1, 1]} : vector<3x128xf32> to vector<1x128xf32>
    %c20 = arith.constant 20 : index
    %c0_16 = arith.constant 0 : index
    %35 = vector.load %arg2[%c20, %c0_16] : memref<27x128xf32, #tpu.memory_space<vmem>>, vector<1x128xf32>
    tpu.vector_store %arg2[%c20, %c0_16], %34 {strides = array<i32>} : memref<27x128xf32, #tpu.memory_space<vmem>>, vector<1x128xf32>,
    %36 = vector.extract_strided_slice %22 {offsets = [2, 0], sizes = [1, 128], strides = [1, 1]} : vector<3x128xf32> to vector<1x128xf32>
    %c12 = arith.constant 12 : index
    %c0_17 = arith.constant 0 : index
    %37 = vector.load %arg2[%c12, %c0_17] : memref<27x128xf32, #tpu.memory_space<vmem>>, vector<1x128xf32>
    tpu.vector_store %arg2[%c12, %c0_17], %36 {strides = array<i32>} : memref<27x128xf32, #tpu.memory_space<vmem>>, vector<1x128xf32>,
    %38 = vector.extract_strided_slice %27 {offsets = [2, 0], sizes = [1, 128], strides = [1, 1]} : vector<3x128xf32> to vector<1x128xf32>
    %c24 = arith.constant 24 : index
    %c0_18 = arith.constant 0 : index
    %39 = vector.load %arg2[%c24, %c0_18] : memref<27x128xf32, #tpu.memory_space<vmem>>, vector<1x128xf32>
    tpu.vector_store %arg2[%c24, %c0_18], %38 {strides = array<i32>} : memref<27x128xf32, #tpu.memory_space<vmem>>, vector<1x128xf32>,
    %cst_19 = arith.constant 2.000000e+00 : f32
    %40 = vector.broadcast %cst_19 : f32 to vector<3x128xf32>
    %41 = arith.mulf %40, %22 : vector<3x128xf32>
    %42 = arith.mulf %41, %27 : vector<3x128xf32>
    %cst_20 = arith.constant 2.000000e+00 : f32
    %43 = vector.broadcast %cst_20 : f32 to vector<3x128xf32>
    %44 = arith.mulf %43, %22 : vector<3x128xf32>
    %45 = arith.mulf %44, %22 : vector<3x128xf32>
    %cst_21 = arith.constant 1.000000e+00 : f32
    %46 = vector.broadcast %cst_21 : f32 to vector<3x128xf32>
    %47 = arith.subf %46, %45 : vector<3x128xf32>
    %48 = vector.extract_strided_slice %42 {offsets = [0, 0], sizes = [1, 128], strides = [1, 1]} : vector<3x128xf32> to vector<1x128xf32>
    %c5 = arith.constant 5 : index
    %c0_22 = arith.constant 0 : index
    %49 = vector.load %arg2[%c5, %c0_22] : memref<27x128xf32, #tpu.memory_space<vmem>>, vector<1x128xf32>
    tpu.vector_store %arg2[%c5, %c0_22], %48 {strides = array<i32>} : memref<27x128xf32, #tpu.memory_space<vmem>>, vector<1x128xf32>,
    %50 = vector.extract_strided_slice %47 {offsets = [0, 0], sizes = [1, 128], strides = [1, 1]} : vector<3x128xf32> to vector<1x128xf32>
    %c17 = arith.constant 17 : index
    %c0_23 = arith.constant 0 : index
    %51 = vector.load %arg2[%c17, %c0_23] : memref<27x128xf32, #tpu.memory_space<vmem>>, vector<1x128xf32>
    tpu.vector_store %arg2[%c17, %c0_23], %50 {strides = array<i32>} : memref<27x128xf32, #tpu.memory_space<vmem>>, vector<1x128xf32>,
    %52 = vector.extract_strided_slice %42 {offsets = [1, 0], sizes = [1, 128], strides = [1, 1]} : vector<3x128xf32> to vector<1x128xf32>
    %c9 = arith.constant 9 : index
    %c0_24 = arith.constant 0 : index
    %53 = vector.load %arg2[%c9, %c0_24] : memref<27x128xf32, #tpu.memory_space<vmem>>, vector<1x128xf32>
    tpu.vector_store %arg2[%c9, %c0_24], %52 {strides = array<i32>} : memref<27x128xf32, #tpu.memory_space<vmem>>, vector<1x128xf32>,
    %54 = vector.extract_strided_slice %47 {offsets = [1, 0], sizes = [1, 128], strides = [1, 1]} : vector<3x128xf32> to vector<1x128xf32>
    %c21 = arith.constant 21 : index
    %c0_25 = arith.constant 0 : index
    %55 = vector.load %arg2[%c21, %c0_25] : memref<27x128xf32, #tpu.memory_space<vmem>>, vector<1x128xf32>
    tpu.vector_store %arg2[%c21, %c0_25], %54 {strides = array<i32>} : memref<27x128xf32, #tpu.memory_space<vmem>>, vector<1x128xf32>,
    %56 = vector.extract_strided_slice %42 {offsets = [2, 0], sizes = [1, 128], strides = [1, 1]} : vector<3x128xf32> to vector<1x128xf32>
    %c13 = arith.constant 13 : index
    %c0_26 = arith.constant 0 : index
    %57 = vector.load %arg2[%c13, %c0_26] : memref<27x128xf32, #tpu.memory_space<vmem>>, vector<1x128xf32>
    tpu.vector_store %arg2[%c13, %c0_26], %56 {strides = array<i32>} : memref<27x128xf32, #tpu.memory_space<vmem>>, vector<1x128xf32>,
    %58 = vector.extract_strided_slice %47 {offsets = [2, 0], sizes = [1, 128], strides = [1, 1]} : vector<3x128xf32> to vector<1x128xf32>
    %c25 = arith.constant 25 : index
    %c0_27 = arith.constant 0 : index
    %59 = vector.load %arg2[%c25, %c0_27] : memref<27x128xf32, #tpu.memory_space<vmem>>, vector<1x128xf32>
    tpu.vector_store %arg2[%c25, %c0_27], %58 {strides = array<i32>} : memref<27x128xf32, #tpu.memory_space<vmem>>, vector<1x128xf32>,
    %cst_28 = arith.constant 2.000000e+00 : f32
    %60 = vector.broadcast %cst_28 : f32 to vector<3x128xf32>
    %61 = arith.mulf %60, %42 : vector<3x128xf32>
    %62 = arith.mulf %61, %47 : vector<3x128xf32>
    %cst_29 = arith.constant 2.000000e+00 : f32
    %63 = vector.broadcast %cst_29 : f32 to vector<3x128xf32>
    %64 = arith.mulf %63, %42 : vector<3x128xf32>
    %65 = arith.mulf %64, %42 : vector<3x128xf32>
    %cst_30 = arith.constant 1.000000e+00 : f32
    %66 = vector.broadcast %cst_30 : f32 to vector<3x128xf32>
    %67 = arith.subf %66, %65 : vector<3x128xf32>
    %68 = vector.extract_strided_slice %62 {offsets = [0, 0], sizes = [1, 128], strides = [1, 1]} : vector<3x128xf32> to vector<1x128xf32>
    %c6 = arith.constant 6 : index
    %c0_31 = arith.constant 0 : index
    %69 = vector.load %arg2[%c6, %c0_31] : memref<27x128xf32, #tpu.memory_space<vmem>>, vector<1x128xf32>
    tpu.vector_store %arg2[%c6, %c0_31], %68 {strides = array<i32>} : memref<27x128xf32, #tpu.memory_space<vmem>>, vector<1x128xf32>,
    %70 = vector.extract_strided_slice %67 {offsets = [0, 0], sizes = [1, 128], strides = [1, 1]} : vector<3x128xf32> to vector<1x128xf32>
    %c18 = arith.constant 18 : index
    %c0_32 = arith.constant 0 : index
    %71 = vector.load %arg2[%c18, %c0_32] : memref<27x128xf32, #tpu.memory_space<vmem>>, vector<1x128xf32>
    tpu.vector_store %arg2[%c18, %c0_32], %70 {strides = array<i32>} : memref<27x128xf32, #tpu.memory_space<vmem>>, vector<1x128xf32>,
    %72 = vector.extract_strided_slice %62 {offsets = [1, 0], sizes = [1, 128], strides = [1, 1]} : vector<3x128xf32> to vector<1x128xf32>
    %c10 = arith.constant 10 : index
    %c0_33 = arith.constant 0 : index
    %73 = vector.load %arg2[%c10, %c0_33] : memref<27x128xf32, #tpu.memory_space<vmem>>, vector<1x128xf32>
    tpu.vector_store %arg2[%c10, %c0_33], %72 {strides = array<i32>} : memref<27x128xf32, #tpu.memory_space<vmem>>, vector<1x128xf32>,
    %74 = vector.extract_strided_slice %67 {offsets = [1, 0], sizes = [1, 128], strides = [1, 1]} : vector<3x128xf32> to vector<1x128xf32>
    %c22 = arith.constant 22 : index
    %c0_34 = arith.constant 0 : index
    %75 = vector.load %arg2[%c22, %c0_34] : memref<27x128xf32, #tpu.memory_space<vmem>>, vector<1x128xf32>
    tpu.vector_store %arg2[%c22, %c0_34], %74 {strides = array<i32>} : memref<27x128xf32, #tpu.memory_space<vmem>>, vector<1x128xf32>,
    %76 = vector.extract_strided_slice %62 {offsets = [2, 0], sizes = [1, 128], strides = [1, 1]} : vector<3x128xf32> to vector<1x128xf32>
    %c14 = arith.constant 14 : index
    %c0_35 = arith.constant 0 : index
    %77 = vector.load %arg2[%c14, %c0_35] : memref<27x128xf32, #tpu.memory_space<vmem>>, vector<1x128xf32>
    tpu.vector_store %arg2[%c14, %c0_35], %76 {strides = array<i32>} : memref<27x128xf32, #tpu.memory_space<vmem>>, vector<1x128xf32>,
    %78 = vector.extract_strided_slice %67 {offsets = [2, 0], sizes = [1, 128], strides = [1, 1]} : vector<3x128xf32> to vector<1x128xf32>
    %c26 = arith.constant 26 : index
    %c0_36 = arith.constant 0 : index
    %79 = vector.load %arg2[%c26, %c0_36] : memref<27x128xf32, #tpu.memory_space<vmem>>, vector<1x128xf32>
    tpu.vector_store %arg2[%c26, %c0_36], %78 {strides = array<i32>} : memref<27x128xf32, #tpu.memory_space<vmem>>, vector<1x128xf32>,
    return
  }
  func.func @transform_0(%arg0: i32) -> (i32, i32) {
    %c0_i32 = arith.constant 0 : i32
    %c0_i32_0 = arith.constant 0 : i32
    return %c0_i32, %arg0 : i32, i32
  }
  func.func @transform_1(%arg0: i32) -> (i32, i32) {
    %c0_i32 = arith.constant 0 : i32
    %c0_i32_0 = arith.constant 0 : i32
    return %c0_i32, %arg0 : i32, i32
  }
}

</mosaic_0001>

<bundles_post_ra>
// kernel: tpu_custom_call.1
= control target key start
LH: loop header
LB: loop body
LE: loop exit
PB: predicated region body
PF: predicated region fallthrough
CT: control target
= control target key end

     0   :  { %6 = vsyncpa [#allocation4], 0  ;;  %s471_s0 = inlined_call_operand.hbm [shape: f32[3,32], index: 0, kind: input, shape index: {}]   ;;  %s472_s1 = inlined_call_operand.hbm [shape: f32[32,27], index: 1, kind: output, shape index: {}]  }
   0x1   :  { %7 = vsyncpa [#allocation5], 0  ;;  %s408_s6 = smov [#allocation3]  }
   0x2   :  { %s14_s7 = sshll.u32 %s408_s6, 4  ;;  %s15_s7 = int_to_ptr.vmem [resolvable:$true] %s14_s7 }
   0x3   :  { %s372_s8 = scalar_lea.vmem %s15_s7, 64  ;;  %p377_p1 = scmp.lt.s32.totalorder %s15_s7, %s15_s7 }
   0x4   :  { %p373_p0 = scmp.ne.s32.totalorder %s15_s7, %s372_s8  ;;  %p378_p2 = scmp.lt.s32.totalorder %s372_s8, %s372_s8 }
   0x6   :  { %p379_p3 = por %p378_p2, %p377_p1 }
   0x8   :  { %p380_p4 = pnand %p379_p3, %p373_p0 }
   0xa   :  { %383 = shalt.err (!%p380_p4)
}
   0xb   :  { %17 = dma.hbm_to_vmem [thread:$0]  %s471_s0, 64, %s15_s7, [#allocation4]  }
   0xc   :  { %404 = dma.done.wait [#allocation4], 64  }
   0xd   :  { %405 = vsyncadd [#allocation4], 4294967232  ;;  %v21_v0 = vld [vmem:[#allocation3] sm:$0x7]  ;;  %v409_v13 = vmov 683565275  }
   0xe   :  { %22 = vst [vmem:[#allocation2] sm:$0x7] %v21_v0  ;;  %v431_v1 = vmul.f32 3.1415927, %v21_v0  ;;  %v410_v15 = vmov 2475754826  }
   0xf   :  { %v411_v17 = vmov 2131351028   ;;  %v412_v19 = vmov 2102212464   ;;  %v413_v21 = vmov 920167782  }
  0x10   :  { %v27_v2 = vand.u32 2139095040, %v431_v1  ;;  %v24_v4 = vand.u32 2147483647, %v431_v1  ;;  %v414_v28 = vmov 1326507024   ;;  %vm26_vm7 = vcmp.lt.s32.totalorder %v431_v1, 0 }
  0x11   :  { %vm116_vm15 = vweird.f32 %v431_v1 }
  0x12   :  { %v28_v3 = vshrl.u32 %v27_v2, 23  ;;  %v31_v7 = vand.u32 8388607, %v24_v4  ;;  %vm25_vm8 = vcmp.le.f32.partialorder %v24_v4, 0.7853982 }
  0x14   :  { %v337_v5 = vadd.s32 4294967169, %v28_v3  ;;  %v32_v10 = vor.u32 8388608, %v31_v7 }
  0x16   :  { %v34_v6 = vadd.s32 1, %v337_v5  ;;  %v72_v30 = vshll.u32 %v32_v10, 8 }
  0x18   :  { %vm35_vm0 = vcmp.gt.s32.totalorder %v34_v6, 0 }
  0x19   :  { %v36_v8 = vsel %vm35_vm0, %v34_v6, 0  ;;  %vm303_vm0 = vcmask 220160  }
  0x1a   :  { %v38_v9 = vand.u32 31, %v36_v8  ;;  %v37_v11 = vshrl.u32 %v36_v8, 5 }
  0x1c   :  { %v39_v12 = vsub.s32 32, %v38_v9  ;;  %v41_v14 = vshll.u32 %v409_v13, %v38_v9  ;;  %v44_v16 = vshll.u32 %v410_v15, %v38_v9  ;;  %v47_v18 = vshll.u32 %v411_v17, %v38_v9 }
  0x1d   :  { %v50_v20 = vshll.u32 %v412_v19, %v38_v9  ;;  %v53_v22 = vshll.u32 %v413_v21, %v38_v9  ;;  %vm56_vm1 = vcmp.lt.s32.totalorder %v37_v11, 1  ;;  %vm59_vm2 = vcmp.lt.s32.totalorder %v37_v11, 4 }
  0x1e   :  { %v40_v23 = vshrl.u32 %v409_v13, %v39_v12  ;;  %v42_v24 = vshrl.u32 %v410_v15, %v39_v12  ;;  %v45_v25 = vshrl.u32 %v411_v17, %v39_v12  ;;  %v48_v26 = vshrl.u32 %v412_v19, %v39_v12 }
  0x1f   :  { %v51_v27 = vshrl.u32 %v413_v21, %v39_v12  ;;  %v54_v29 = vshrl.u32 %v414_v28, %v39_v12  ;;  %vm57_vm3 = vcmp.lt.s32.totalorder %v37_v11, 2  ;;  %vm58_vm4 = vcmp.lt.s32.totalorder %v37_v11, 3 }
  0x20   :  { %v43_v31 = vor.u32 %v42_v24, %v41_v14  ;;  %v46_v32 = vor.u32 %v45_v25, %v44_v16  ;;  %v49_v33 = vor.u32 %v48_v26, %v47_v18 }
  0x21   :  { %v52_v34 = vor.u32 %v51_v27, %v50_v20  ;;  %v55_v35 = vor.u32 %v54_v29, %v53_v22 }
  0x22   :  { %v60_v36 = vsel %vm56_vm1, %v40_v23, %v43_v31  ;;  %v61_v37 = vsel %vm59_vm2, %v49_v33, 2102212464  ;;  %v64_v38 = vsel %vm56_vm1, %v43_v31, %v46_v32  ;;  %v68_v39 = vsel %vm56_vm1, %v46_v32, %v49_v33 }
  0x23   :  { %v62_v40 = vsel %vm58_vm4, %v46_v32, %v61_v37  ;;  %v65_v41 = vsel %vm59_vm2, %v52_v34, 920167782  ;;  %v69_v42 = vsel %vm59_vm2, %v55_v35, 1326507024 }
  0x24   :  { %v66_v43 = vsel %vm58_vm4, %v49_v33, %v65_v41  ;;  %v70_v44 = vsel %vm58_vm4, %v52_v34, %v69_v42  ;;  %v63_v45 = vsel %vm57_vm3, %v60_v36, %v62_v40 }
  0x25   :  { %v67_v46 = vsel %vm57_vm3, %v64_v38, %v66_v43  ;;  %v71_v47 = vsel %vm57_vm3, %v68_v39, %v70_v44  ;;  %v79_v52 = vmul.u32 %v72_v30, %v63_v45 }
  0x26   :  { %v437_v48 = vmul.u32.u64.low %v72_v30, %v71_v47  ;;  %v438_v49 = vmul.u32.u64.high %v72_v30, %v71_v47, %v437_v48  ;;  %v440_v50 = vmul.u32.u64.low %v72_v30, %v67_v46  ;;  %v441_v51 = vmul.u32.u64.high %v72_v30, %v67_v46, %v440_v50 }
  0x28   :  { %vm81_vm5 = vc.u32 %v438_v49, %v440_v50  ;;  %v82_v53 = vadd.s32 1, %v441_v51  ;;  %v80_v0 = vadd.s32 %v440_v50, %v438_v49 }
  0x2a   :  { %v83_v54 = vsel %vm81_vm5, %v82_v53, %v441_v51 }
  0x2b   :  { %v84_v55 = vadd.s32 %v83_v54, %v79_v52 }
  0x2d   :  { %v85_v56 = vadd.s32 536870912, %v84_v55 }
  0x2f   :  { %v86_v57 = vshrl.u32 %v85_v56, 30 }
  0x31   :  { %v87_v58 = vshll.u32 %v86_v57, 30  ;;  %v110_v15 = vsub.s32 4, %v86_v57 }
  0x33   :  { %v88_v59 = vsub.s32 %v84_v55, %v87_v58  ;;  %v111_v18 = vsel %vm26_vm7, %v110_v15, %v86_v57 }
  0x34   :  { %v113_v20 = vsel %vm25_vm8, 0, %v111_v18 }
  0x35   :  { %v90_v60 = vsub.s32 0, %v88_v59  ;;  %v117_v21 = vadd.s32 3, %v113_v20  ;;  %v221_v23 = vand.u32 3, %v113_v20 }
  0x37   :  { %v338_v61 = vmin.u32 %v90_v60, %v88_v59  ;;  %v118_v22 = vand.u32 3, %v117_v21  ;;  %vm226_vm10 = vcmp.eq.s32.totalorder %v221_v23, 2  ;;  %vm223_vm12 = vcmp.eq.s32.totalorder %v221_v23, 0 }
  0x38   :  { %vm222_vm14 = vcmp.lt.s32.totalorder %v221_v23, 2 }
  0x39   :  { %v92_v62 = vclz %v338_v61  ;;  %vm123_vm9 = vcmp.eq.s32.totalorder %v118_v22, 2  ;;  %vm120_vm11 = vcmp.eq.s32.totalorder %v118_v22, 0  ;;  %vm119_vm13 = vcmp.lt.s32.totalorder %v118_v22, 2 }
  0x3b   :  { %v339_v63 = vadd.s32 4294967294, %v92_v62 }
  0x3d   :  { %vm340_vm6 = vcmp.lt.s32.totalorder %v339_v63, 0 }
  0x3e   :  { %v95_v2 = vsel %vm340_vm6, 0, %v339_v63 }
  0x3f   :  { %v96_v3 = vsub.s32 32, %v95_v2  ;;  %v97_v5 = vshll.u32 %v88_v59, %v95_v2  ;;  %v100_v6 = vsub.s32 4294967266, %v95_v2 }
  0x41   :  { %v98_v7 = vshrl.u32 %v80_v0, %v96_v3  ;;  %v101_v8 = vadd.s32 127, %v100_v6 }
  0x43   :  { %v99_v9 = vor.u32 %v98_v7, %v97_v5  ;;  %v102_v10 = vshll.u32 %v101_v8, 23 }
  0x45   :  { %v103_v11 = vor.u32 4788187, %v102_v10  ;;  %v106_v12 = vcvt.s32.f32 %v99_v9 }
  0x47   :  { %v104_v13 = vand.u32 2147483647, %v103_v11 }
  0x49   :  { %v107_v14 = vmul.f32 %v106_v12, %v104_v13 }
  0x4b   :  { %v108_v16 = vxor.u32 2147483648, %v107_v14 }
  0x4d   :  { %v109_v17 = vsel %vm26_vm7, %v108_v16, %v107_v14 }
  0x4e   :  { %v112_v19 = vsel %vm25_vm8, %v431_v1, %v109_v17 }
  0x4f   :  { %360 = vcosq.f32 %v112_v19 }
  0x50   :  { %362 = vsinq.f32 %v112_v19 }
  0x5c   :  { %v361_v24 = vpop.eup %360 }
  0x5d   :  { %v363_v25 = vpop.eup %362  ;;  %v124_v26 = vxor.u32 2147483648, %v361_v24 }
  0x5e   :  { %v121_v4 = vxor.u32 2147483648, %v363_v25 }
  0x5f   :  { %v125_v27 = vsel %vm123_vm9, %v124_v26, %v363_v25  ;;  %v228_v28 = vsel %vm226_vm10, %v124_v26, %v363_v25 }
  0x60   :  { %v122_v29 = vsel %vm120_vm11, %v361_v24, %v121_v4  ;;  %v225_v30 = vsel %vm223_vm12, %v361_v24, %v121_v4 }
  0x61   :  { %v126_v31 = vsel %vm119_vm13, %v122_v29, %v125_v27  ;;  %v229_v32 = vsel %vm222_vm14, %v225_v30, %v228_v28 }
  0x62   :  { %v127_v33 = vsel %vm116_vm15, nan, %v126_v31  ;;  %v230_v34 = vsel %vm116_vm15, nan, %v229_v32 }
  0x63   :  { %231 = vst [vmem:[#allocation2 + $0x3] sm:$0x1] %v127_v33  ;;  %233 = vst [vmem:[#allocation2 + $0x6] sm:$0x2] %v127_v33  ;;  %v237_v35 = vmul.f32 2.0, %v127_v33 }
  0x64   :  { %232 = vst [vmem:[#allocation2 + $0xf] sm:$0x1] %v230_v34  ;;  %234 = vst [vmem:[#allocation2 + $0x12] sm:$0x2] %v230_v34 }
  0x65   :  { %235 = vst [vmem:[#allocation2 + $0x9] sm:$0x4] %v127_v33  ;;  %236 = vst [vmem:[#allocation2 + $0x15] sm:$0x4] %v230_v34  ;;  %v238_v36 = vmul.f32 %v237_v35, %v230_v34  ;;  %v239_v37 = vmul.f32 %v237_v35, %v127_v33 }
  0x67   :  { %v240_v38 = vsub.f32 1.0, %v239_v37  ;;  %241 = vst [vmem:[#allocation2 + $0x4] sm:$0x1] %v238_v36  ;;  %v247_v1 = vmul.f32 2.0, %v238_v36  ;;  %243 = vst [vmem:[#allocation2 + $0x7] sm:$0x2] %v238_v36 }
  0x68   :  { %245 = vst [vmem:[#allocation2 + $0xa] sm:$0x4] %v238_v36 }
  0x69   :  { %v248_v39 = vmul.f32 %v247_v1, %v240_v38  ;;  %v249_v40 = vmul.f32 %v247_v1, %v238_v36  ;;  %242 = vst [vmem:[#allocation2 + $0x10] sm:$0x1] %v240_v38  ;;  %244 = vst [vmem:[#allocation2 + $0x13] sm:$0x2] %v240_v38 }
  0x6a   :  { %246 = vst [vmem:[#allocation2 + $0x16] sm:$0x4] %v240_v38 }
  0x6b   :  { %v250_v41 = vsub.f32 1.0, %v249_v40  ;;  %251 = vst [vmem:[#allocation2 + $0x5] sm:$0x1] %v248_v39  ;;  %v257_v42 = vmul.f32 2.0, %v248_v39  ;;  %253 = vst [vmem:[#allocation2 + $0x8] sm:$0x2] %v248_v39 }
  0x6c   :  { %255 = vst [vmem:[#allocation2 + $0xb] sm:$0x4] %v248_v39 }
  0x6d   :  { %v258_v43 = vmul.f32 %v257_v42, %v250_v41  ;;  %252 = vst [vmem:[#allocation2 + $0x11] sm:$0x1] %v250_v41  ;;  %254 = vst [vmem:[#allocation2 + $0x14] sm:$0x2] %v250_v41  ;;  %v259_v44 = vmul.f32 %v257_v42, %v248_v39 }
  0x6e   :  { %256 = vst [vmem:[#allocation2 + $0x17] sm:$0x4] %v250_v41 }
  0x6f   :  { %261 = vst [vmem:[#allocation2 + $0x6] sm:$0x1] %v258_v43  ;;  %263 = vst [vmem:[#allocation2 + $0x9] sm:$0x2] %v258_v43  ;;  %v260_v45 = vsub.f32 1.0, %v259_v44 }
  0x70   :  { %265 = vst [vmem:[#allocation2 + $0xc] sm:$0x4] %v258_v43 }
  0x71   :  { %262 = vst [vmem:[#allocation2 + $0x12] sm:$0x1] %v260_v45  ;;  %264 = vst [vmem:[#allocation2 + $0x15] sm:$0x2] %v260_v45 }
  0x72   :  { %266 = vst [vmem:[#allocation2 + $0x18] sm:$0x4] %v260_v45 }
  0x76   :  { %v267_v46 = vld [vmem:[#allocation2] sm:$0xff] }
  0x77   :  { %271 = vxpose.xlu0.b32.start [1/4] (short) %v267_v46, 128  ;;  %v268_v47 = vld [vmem:[#allocation2 + $0x8] sm:$0xff] }
  0x78   :  { %v269_v48 = vld [vmem:[#allocation2 + $0x10] sm:$0xff] }
  0x79   :  { %v270_v49 = vld [vmem:[#allocation2 + $0x18] sm:$0xff] }
  0x7b   :  { %272 = vxpose.xlu0.b32.cont [2/4] (short) %v268_v47, 128 }
  0x7f   :  { %273 = vxpose.xlu0.b32.cont [3/4] (short) %v269_v48, 128 }
  0x83   :  { %274 = vxpose.xlu0.b32.end [4/4] (short) %v270_v49, 128 }
  0xf3   :  { %v287_v50 = vpop.trf.xlu0 }
  0xf4   :  { %304 = vst.msk [vmem:[#allocation6] sm:$0xff] %vm303_vm0, %v287_v50 }
  0xf7   :  { %v288_v51 = vpop.trf.xlu0 }
  0xf8   :  { %305 = vst.msk [vmem:[#allocation6 + $0x8] sm:$0xff] %vm303_vm0, %v288_v51 }
  0xfb   :  { %v289_v52 = vpop.trf.xlu0 }
  0xfc   :  { %306 = vst.msk [vmem:[#allocation6 + $0x10] sm:$0xff] %vm303_vm0, %v289_v52 }
  0xff   :  { %v290_v53 = vpop.trf.xlu0 }
 0x100   :  { %307 = vst.msk [vmem:[#allocation6 + $0x18] sm:$0xff] %vm303_vm0, %v290_v53 }
 0x103   :  { %v291_v54 = vpop.trf.xlu0 }
 0x104   :  { %308 = vst.msk [vmem:[#allocation6 + $0x20] sm:$0xff] %vm303_vm0, %v291_v54 }
 0x107   :  { %v292_v55 = vpop.trf.xlu0 }
 0x108   :  { %309 = vst.msk [vmem:[#allocation6 + $0x28] sm:$0xff] %vm303_vm0, %v292_v55 }
 0x10b   :  { %v293_v56 = vpop.trf.xlu0 }
 0x10c   :  { %310 = vst.msk [vmem:[#allocation6 + $0x30] sm:$0xff] %vm303_vm0, %v293_v56 }
 0x10f   :  { %v294_v57 = vpop.trf.xlu0 }
 0x110   :  { %311 = vst.msk [vmem:[#allocation6 + $0x38] sm:$0xff] %vm303_vm0, %v294_v57 }
 0x113   :  { %v295_v58 = vpop.trf.xlu0 }
 0x114   :  { %312 = vst.msk [vmem:[#allocation6 + $0x40] sm:$0xff] %vm303_vm0, %v295_v58 }
 0x117   :  { %v296_v59 = vpop.trf.xlu0 }
 0x118   :  { %313 = vst.msk [vmem:[#allocation6 + $0x48] sm:$0xff] %vm303_vm0, %v296_v59 }
 0x11b   :  { %v297_v60 = vpop.trf.xlu0 }
 0x11c   :  { %314 = vst.msk [vmem:[#allocation6 + $0x50] sm:$0xff] %vm303_vm0, %v297_v60 }
 0x11f   :  { %v298_v61 = vpop.trf.xlu0 }
 0x120   :  { %315 = vst.msk [vmem:[#allocation6 + $0x58] sm:$0xff] %vm303_vm0, %v298_v61 }
 0x123   :  { %v299_v62 = vpop.trf.xlu0 }
 0x124   :  { %316 = vst.msk [vmem:[#allocation6 + $0x60] sm:$0xff] %vm303_vm0, %v299_v62 }
 0x127   :  { %v300_v63 = vpop.trf.xlu0 }
 0x128   :  { %317 = vst.msk [vmem:[#allocation6 + $0x68] sm:$0xff] %vm303_vm0, %v300_v63 }
 0x12b   :  { %v301_v0 = vpop.trf.xlu0 }
 0x12c   :  { %318 = vst.msk [vmem:[#allocation6 + $0x70] sm:$0xff] %vm303_vm0, %v301_v0 }
 0x12f   :  { %v302_v2 = vpop.trf.xlu0 }
 0x130   :  { %319 = vst.msk [vmem:[#allocation6 + $0x78] sm:$0xff] %vm303_vm0, %v302_v2 }
 0x131   :  { %324 = vsyncadd [#allocation5], 1536  ;;  %s415_s0 = smov [#allocation6]  }
 0x132   :  { %s325_s11 = sshll.u32 %s415_s0, 4  ;;  %s326_s11 = int_to_ptr.vmem [resolvable:$true] %s325_s11 }
 0x133   :  { %s384_s12 = scalar_lea.vmem %s326_s11, 512  ;;  %s388_s13 = scalar_lea.vmem %s326_s11, 2048 }
 0x134   :  { %p385_p5 = scmp.ne.s32.totalorder %s326_s11, %s384_s12  ;;  %p389_p6 = scmp.lt.s32.totalorder %s326_s11, %s326_s11 }
 0x135   :  { %p390_p7 = scmp.lt.s32.totalorder %s388_s13, %s384_s12 }
 0x137   :  { %p391_p8 = por %p390_p7, %p389_p6 }
 0x139   :  { %p392_p9 = pnand %p391_p8, %p385_p5 }
 0x13b   :  { %395 = shalt.err (!%p392_p9)
}
 0x13c   :  { %s416_s14 = smov 128   ;;  %s417_s15 = smov 8  }
 0x13d   :  { %331 = dma.vmem_to_hbm [thread:$0]  %s326_s11, 512, %s472_s1, [#allocation5], %s416_s14, %s416_s14, %s417_s15  }
 0x13e   :  { %406 = dma.done.wait [#allocation5], 2048  }
 0x13f   :  { %407 = vsyncadd [#allocation5], 4294965248 }
 0x140   :  { %335 = vsyncpa [#allocation4], 1 }
 0x141   :  { %336 = vsyncpa [#allocation5], 1 }

// kernel: tpu_custom_call.1
= control target key start
LH: loop header
LB: loop body
LE: loop exit
PB: predicated region body
PF: predicated region fallthrough
CT: control target
= control target key end

     0   :  { %6 = vsyncpa [#allocation3], 0  ;;  %s401_s0 = inlined_call_operand.hbm [shape: f32[3,32], index: 0, kind: input, shape index: {}]   ;;  %s402_s1 = inlined_call_operand.hbm [shape: f32[27,32], index: 1, kind: output, shape index: {}]  }
   0x1   :  { %7 = vsyncpa [#allocation4], 0  ;;  %s354_s6 = smov [#allocation2]  }
   0x2   :  { %s14_s7 = sshll.u32 %s354_s6, 4  ;;  %s15_s7 = int_to_ptr.vmem [resolvable:$true] %s14_s7 }
   0x3   :  { %s318_s8 = scalar_lea.vmem %s15_s7, 64  ;;  %p323_p1 = scmp.lt.s32.totalorder %s15_s7, %s15_s7 }
   0x4   :  { %p319_p0 = scmp.ne.s32.totalorder %s15_s7, %s318_s8  ;;  %p324_p2 = scmp.lt.s32.totalorder %s318_s8, %s318_s8 }
   0x6   :  { %p325_p3 = por %p324_p2, %p323_p1 }
   0x8   :  { %p326_p4 = pnand %p325_p3, %p319_p0 }
   0xa   :  { %329 = shalt.err (!%p326_p4)
}
   0xb   :  { %17 = dma.hbm_to_vmem [thread:$0]  %s401_s0, 64, %s15_s7, [#allocation3]  }
   0xc   :  { %350 = dma.done.wait [#allocation3], 64  }
   0xd   :  { %351 = vsyncadd [#allocation3], 4294967232  ;;  %v21_v0 = vld [vmem:[#allocation2] sm:$0x7]  ;;  %v355_v13 = vmov 683565275  }
   0xe   :  { %22 = vst [vmem:[#allocation5] sm:$0x7] %v21_v0  ;;  %v377_v1 = vmul.f32 3.1415927, %v21_v0  ;;  %v356_v15 = vmov 2475754826  }
   0xf   :  { %v357_v17 = vmov 2131351028   ;;  %v358_v19 = vmov 2102212464   ;;  %v359_v21 = vmov 920167782  }
  0x10   :  { %v27_v2 = vand.u32 2139095040, %v377_v1  ;;  %v24_v4 = vand.u32 2147483647, %v377_v1  ;;  %v360_v28 = vmov 1326507024   ;;  %vm26_vm7 = vcmp.lt.s32.totalorder %v377_v1, 0 }
  0x11   :  { %vm116_vm15 = vweird.f32 %v377_v1  ;;  %s361_s0 = smov [#allocation5]  }
  0x12   :  { %v28_v3 = vshrl.u32 %v27_v2, 23  ;;  %v31_v7 = vand.u32 8388607, %v24_v4  ;;  %vm25_vm8 = vcmp.le.f32.partialorder %v24_v4, 0.7853982  ;;  %s272_s11 = sshll.u32 %s361_s0, 4  ;;  %s273_s11 = int_to_ptr.vmem [resolvable:$true] %s272_s11 }
  0x13   :  { %s330_s12 = scalar_lea.vmem %s273_s11, 512  ;;  %p335_p6 = scmp.lt.s32.totalorder %s273_s11, %s273_s11 }
  0x14   :  { %v284_v5 = vadd.s32 4294967169, %v28_v3  ;;  %v32_v10 = vor.u32 8388608, %v31_v7  ;;  %p331_p5 = scmp.ne.s32.totalorder %s273_s11, %s330_s12  ;;  %p336_p7 = scmp.lt.s32.totalorder %s330_s12, %s330_s12 }
  0x16   :  { %v34_v6 = vadd.s32 1, %v284_v5  ;;  %v72_v30 = vshll.u32 %v32_v10, 8  ;;  %p337_p8 = por %p336_p7, %p335_p6 }
  0x18   :  { %vm35_vm0 = vcmp.gt.s32.totalorder %v34_v6, 0  ;;  %p338_p9 = pnand %p337_p8, %p331_p5 }
  0x19   :  { %v36_v8 = vsel %vm35_vm0, %v34_v6, 0 }
  0x1a   :  { %v38_v9 = vand.u32 31, %v36_v8  ;;  %v37_v11 = vshrl.u32 %v36_v8, 5 }
  0x1c   :  { %v39_v12 = vsub.s32 32, %v38_v9  ;;  %v41_v14 = vshll.u32 %v355_v13, %v38_v9  ;;  %v44_v16 = vshll.u32 %v356_v15, %v38_v9  ;;  %v47_v18 = vshll.u32 %v357_v17, %v38_v9 }
  0x1d   :  { %v50_v20 = vshll.u32 %v358_v19, %v38_v9  ;;  %v53_v22 = vshll.u32 %v359_v21, %v38_v9  ;;  %vm56_vm1 = vcmp.lt.s32.totalorder %v37_v11, 1  ;;  %vm59_vm2 = vcmp.lt.s32.totalorder %v37_v11, 4 }
  0x1e   :  { %v40_v23 = vshrl.u32 %v355_v13, %v39_v12  ;;  %v42_v24 = vshrl.u32 %v356_v15, %v39_v12  ;;  %v45_v25 = vshrl.u32 %v357_v17, %v39_v12  ;;  %v48_v26 = vshrl.u32 %v358_v19, %v39_v12 }
  0x1f   :  { %v51_v27 = vshrl.u32 %v359_v21, %v39_v12  ;;  %v54_v29 = vshrl.u32 %v360_v28, %v39_v12  ;;  %vm57_vm3 = vcmp.lt.s32.totalorder %v37_v11, 2  ;;  %vm58_vm4 = vcmp.lt.s32.totalorder %v37_v11, 3 }
  0x20   :  { %v43_v31 = vor.u32 %v42_v24, %v41_v14  ;;  %v46_v32 = vor.u32 %v45_v25, %v44_v16  ;;  %v49_v33 = vor.u32 %v48_v26, %v47_v18 }
  0x21   :  { %v52_v34 = vor.u32 %v51_v27, %v50_v20  ;;  %v55_v35 = vor.u32 %v54_v29, %v53_v22 }
  0x22   :  { %v60_v36 = vsel %vm56_vm1, %v40_v23, %v43_v31  ;;  %v61_v37 = vsel %vm59_vm2, %v49_v33, 2102212464  ;;  %v64_v38 = vsel %vm56_vm1, %v43_v31, %v46_v32  ;;  %v68_v39 = vsel %vm56_vm1, %v46_v32, %v49_v33 }
  0x23   :  { %v62_v40 = vsel %vm58_vm4, %v46_v32, %v61_v37  ;;  %v65_v41 = vsel %vm59_vm2, %v52_v34, 920167782  ;;  %v69_v42 = vsel %vm59_vm2, %v55_v35, 1326507024 }
  0x24   :  { %v66_v43 = vsel %vm58_vm4, %v49_v33, %v65_v41  ;;  %v70_v44 = vsel %vm58_vm4, %v52_v34, %v69_v42  ;;  %v63_v45 = vsel %vm57_vm3, %v60_v36, %v62_v40 }
  0x25   :  { %v67_v46 = vsel %vm57_vm3, %v64_v38, %v66_v43  ;;  %v71_v47 = vsel %vm57_vm3, %v68_v39, %v70_v44  ;;  %v79_v52 = vmul.u32 %v72_v30, %v63_v45 }
  0x26   :  { %v383_v48 = vmul.u32.u64.low %v72_v30, %v71_v47  ;;  %v384_v49 = vmul.u32.u64.high %v72_v30, %v71_v47, %v383_v48  ;;  %v386_v50 = vmul.u32.u64.low %v72_v30, %v67_v46  ;;  %v387_v51 = vmul.u32.u64.high %v72_v30, %v67_v46, %v386_v50 }
  0x28   :  { %vm81_vm5 = vc.u32 %v384_v49, %v386_v50  ;;  %v82_v53 = vadd.s32 1, %v387_v51  ;;  %v80_v0 = vadd.s32 %v386_v50, %v384_v49 }
  0x2a   :  { %v83_v54 = vsel %vm81_vm5, %v82_v53, %v387_v51 }
  0x2b   :  { %v84_v55 = vadd.s32 %v83_v54, %v79_v52 }
  0x2d   :  { %v85_v56 = vadd.s32 536870912, %v84_v55 }
  0x2f   :  { %v86_v57 = vshrl.u32 %v85_v56, 30 }
  0x31   :  { %v87_v58 = vshll.u32 %v86_v57, 30  ;;  %v110_v15 = vsub.s32 4, %v86_v57 }
  0x33   :  { %v88_v59 = vsub.s32 %v84_v55, %v87_v58  ;;  %v111_v19 = vsel %vm26_vm7, %v110_v15, %v86_v57 }
  0x34   :  { %v113_v20 = vsel %vm25_vm8, 0, %v111_v19 }
  0x35   :  { %v90_v60 = vsub.s32 0, %v88_v59  ;;  %v117_v21 = vadd.s32 3, %v113_v20  ;;  %v221_v23 = vand.u32 3, %v113_v20 }
  0x37   :  { %v285_v61 = vmin.u32 %v90_v60, %v88_v59  ;;  %v118_v22 = vand.u32 3, %v117_v21  ;;  %vm226_vm10 = vcmp.eq.s32.totalorder %v221_v23, 2  ;;  %vm223_vm12 = vcmp.eq.s32.totalorder %v221_v23, 0 }
  0x38   :  { %vm222_vm14 = vcmp.lt.s32.totalorder %v221_v23, 2 }
  0x39   :  { %v92_v62 = vclz %v285_v61  ;;  %vm123_vm9 = vcmp.eq.s32.totalorder %v118_v22, 2  ;;  %vm120_vm11 = vcmp.eq.s32.totalorder %v118_v22, 0  ;;  %vm119_vm13 = vcmp.lt.s32.totalorder %v118_v22, 2 }
  0x3b   :  { %v286_v63 = vadd.s32 4294967294, %v92_v62 }
  0x3d   :  { %vm287_vm6 = vcmp.lt.s32.totalorder %v286_v63, 0 }
  0x3e   :  { %v95_v2 = vsel %vm287_vm6, 0, %v286_v63 }
  0x3f   :  { %v96_v3 = vsub.s32 32, %v95_v2  ;;  %v97_v5 = vshll.u32 %v88_v59, %v95_v2  ;;  %v100_v6 = vsub.s32 4294967266, %v95_v2 }
  0x41   :  { %v98_v7 = vshrl.u32 %v80_v0, %v96_v3  ;;  %v101_v8 = vadd.s32 127, %v100_v6 }
  0x43   :  { %v99_v9 = vor.u32 %v98_v7, %v97_v5  ;;  %v102_v10 = vshll.u32 %v101_v8, 23 }
  0x45   :  { %v103_v11 = vor.u32 4788187, %v102_v10  ;;  %v106_v12 = vcvt.s32.f32 %v99_v9 }
  0x47   :  { %v104_v13 = vand.u32 2147483647, %v103_v11 }
  0x49   :  { %v107_v14 = vmul.f32 %v106_v12, %v104_v13 }
  0x4b   :  { %v108_v16 = vxor.u32 2147483648, %v107_v14 }
  0x4d   :  { %v109_v17 = vsel %vm26_vm7, %v108_v16, %v107_v14 }
  0x4e   :  { %v112_v18 = vsel %vm25_vm8, %v377_v1, %v109_v17 }
  0x4f   :  { %306 = vcosq.f32 %v112_v18 }
  0x50   :  { %308 = vsinq.f32 %v112_v18 }
  0x5c   :  { %v307_v24 = vpop.eup %306 }
  0x5d   :  { %v309_v25 = vpop.eup %308  ;;  %v124_v26 = vxor.u32 2147483648, %v307_v24 }
  0x5e   :  { %v121_v4 = vxor.u32 2147483648, %v309_v25 }
  0x5f   :  { %v125_v27 = vsel %vm123_vm9, %v124_v26, %v309_v25  ;;  %v228_v28 = vsel %vm226_vm10, %v124_v26, %v309_v25 }
  0x60   :  { %v122_v29 = vsel %vm120_vm11, %v307_v24, %v121_v4  ;;  %v225_v30 = vsel %vm223_vm12, %v307_v24, %v121_v4 }
  0x61   :  { %v126_v31 = vsel %vm119_vm13, %v122_v29, %v125_v27  ;;  %v229_v32 = vsel %vm222_vm14, %v225_v30, %v228_v28 }
  0x62   :  { %v127_v33 = vsel %vm116_vm15, nan, %v126_v31  ;;  %v230_v34 = vsel %vm116_vm15, nan, %v229_v32 }
  0x63   :  { %231 = vst [vmem:[#allocation5 + $0x3] sm:$0x1] %v127_v33  ;;  %233 = vst [vmem:[#allocation5 + $0x6] sm:$0x2] %v127_v33  ;;  %v237_v35 = vmul.f32 2.0, %v127_v33 }
  0x64   :  { %235 = vst [vmem:[#allocation5 + $0x9] sm:$0x4] %v127_v33  ;;  %232 = vst [vmem:[#allocation5 + $0xf] sm:$0x1] %v230_v34 }
  0x65   :  { %234 = vst [vmem:[#allocation5 + $0x12] sm:$0x2] %v230_v34  ;;  %236 = vst [vmem:[#allocation5 + $0x15] sm:$0x4] %v230_v34  ;;  %v238_v36 = vmul.f32 %v237_v35, %v230_v34  ;;  %v239_v37 = vmul.f32 %v237_v35, %v127_v33 }
  0x67   :  { %241 = vst [vmem:[#allocation5 + $0x4] sm:$0x1] %v238_v36  ;;  %243 = vst [vmem:[#allocation5 + $0x7] sm:$0x2] %v238_v36  ;;  %v240_v1 = vsub.f32 1.0, %v239_v37  ;;  %v247_v38 = vmul.f32 2.0, %v238_v36 }
  0x68   :  { %245 = vst [vmem:[#allocation5 + $0xa] sm:$0x4] %v238_v36 }
  0x69   :  { %242 = vst [vmem:[#allocation5 + $0x10] sm:$0x1] %v240_v1  ;;  %244 = vst [vmem:[#allocation5 + $0x13] sm:$0x2] %v240_v1  ;;  %v248_v39 = vmul.f32 %v247_v38, %v240_v1  ;;  %v249_v40 = vmul.f32 %v247_v38, %v238_v36 }
  0x6a   :  { %246 = vst [vmem:[#allocation5 + $0x16] sm:$0x4] %v240_v1 }
  0x6b   :  { %251 = vst [vmem:[#allocation5 + $0x5] sm:$0x1] %v248_v39  ;;  %253 = vst [vmem:[#allocation5 + $0x8] sm:$0x2] %v248_v39  ;;  %v250_v41 = vsub.f32 1.0, %v249_v40  ;;  %v257_v42 = vmul.f32 2.0, %v248_v39 }
  0x6c   :  { %255 = vst [vmem:[#allocation5 + $0xb] sm:$0x4] %v248_v39 }
  0x6d   :  { %252 = vst [vmem:[#allocation5 + $0x11] sm:$0x1] %v250_v41  ;;  %254 = vst [vmem:[#allocation5 + $0x14] sm:$0x2] %v250_v41  ;;  %v258_v43 = vmul.f32 %v257_v42, %v250_v41  ;;  %v259_v44 = vmul.f32 %v257_v42, %v248_v39 }
  0x6e   :  { %256 = vst [vmem:[#allocation5 + $0x17] sm:$0x4] %v250_v41 }
  0x6f   :  { %261 = vst [vmem:[#allocation5 + $0x6] sm:$0x1] %v258_v43  ;;  %263 = vst [vmem:[#allocation5 + $0x9] sm:$0x2] %v258_v43  ;;  %v260_v45 = vsub.f32 1.0, %v259_v44 }
  0x70   :  { %265 = vst [vmem:[#allocation5 + $0xc] sm:$0x4] %v258_v43 }
  0x71   :  { %262 = vst [vmem:[#allocation5 + $0x12] sm:$0x1] %v260_v45  ;;  %264 = vst [vmem:[#allocation5 + $0x15] sm:$0x2] %v260_v45 }
  0x72   :  { %266 = vst [vmem:[#allocation5 + $0x18] sm:$0x4] %v260_v45 }
  0x73   :  { %341 = shalt.err (!%p338_p9)
}
  0x74   :  { %s362_s13 = smov 128   ;;  %s363_s14 = smov 8  }
  0x75   :  { %278 = dma.vmem_to_hbm [thread:$0]  %s273_s11, 512, %s402_s1, [#allocation4], %s362_s13, %s362_s13, %s363_s14  }
  0x76   :  { %352 = dma.done.wait [#allocation4], 512  }
  0x77   :  { %353 = vsyncadd [#allocation4], 4294966784 }
  0x78   :  { %282 = vsyncpa [#allocation3], 1 }
  0x79   :  { %283 = vsyncpa [#allocation4], 1 }

</bundles_post_ra>
